<compile_context>
chip_gen: v5e
topology: v5e:2x2
jax: 0.10.0
libtpu: 0.0.40
codegen_flags: <defaults>
</compile_context>

<pallas_src>
import jax
import jax.numpy as jnp
import numpy as np
from jax.experimental import pallas as pl
from jax.experimental.pallas import tpu as pltpu


def _round_up(x, m):
    return (x + m - 1) // m * m


def _make_kernel(is_regression: bool, p_pad: int, mxu_bf16: bool):
    def kernel(lab_i_ref, pred_i_ref, lab_j_ref, pred_j_ref,
               maj_ref, min_ref, out_ref, acc_ref):
        bj = pl.program_id(1)

        @pl.when(bj == 0)
        def _init():
            acc_ref[...] = jnp.zeros_like(acc_ref)

        li = lab_i_ref[...]          # (T, 1) labels of the row block
        lj = lab_j_ref[...]          # (1, T) labels of the column block
        pi = pred_i_ref[...]         # (T, 1) predictions of the row block
        pj = pred_j_ref[...]         # (1, T) predictions of the column block

        if is_regression:
            d = li - lj
            ldist = jnp.exp(-(d * d))            # one EUP pass serves all P pairs
        else:
            ldist = (li == lj).astype(jnp.float32)

        # M[i,j] = ldist[i,j] * (pred_i - pred_j): VPU work hidden under the MXU.
        m_mat = ldist * (pi - pj)                # (T, T)

        if mxu_bf16:
            # Opt-in: ~4x MXU rate, ~1e-3 relative error (masks are exact bf16,
            # M carries bf16 rounding of the pred difference / exp).
            mm = jnp.dot(m_mat.astype(jnp.bfloat16), min_ref[...],
                         preferred_element_type=jnp.float32)       # (T, P_pad)
        else:
            mm = jnp.dot(m_mat, min_ref[...].astype(jnp.float32),
                         preferred_element_type=jnp.float32)       # (T, P_pad)

        contrib = maj_ref[...].astype(jnp.float32) * mm            # (T, P_pad)
        t = contrib.shape[0]
        # Per-sublane partial sums: pure vreg adds, no per-step XLU reduce.
        acc_ref[...] += contrib.reshape(t // 8, 8, p_pad).sum(axis=0)

        @pl.when(bj == pl.num_programs(1) - 1)
        def _finalize():
            out_ref[...] = acc_ref[...].reshape(1, 8, p_pad)

    return kernel


def cross_pair_distance(pred, labels, sensitive, majority_minority_pairs,
                        is_regression: bool = True, tile: int = 1024,
                        mxu_bf16: bool = False, row_core_parallel: bool = False):
    """Pallas implementation of CrossPairDistance.forward.

    pred:      (N,)   float32 predictions
    labels:    (N,)   float32 labels
    sensitive: (N, C) float32 dummy-coded group membership (0/1)
    majority_minority_pairs: list of (maj_col_idx, [min_col_idx, ...])
    returns:   (P,)   float32, one squared masked-mean per (maj, min) pair
    """
    pred = jnp.asarray(pred, jnp.float32).reshape(-1)
    labels = jnp.asarray(labels, jnp.float32).reshape(-1)
    sensitive = jnp.asarray(sensitive, jnp.float32)
    if pred.shape != labels.shape:
        raise ValueError("pred and labels must be the same size")
    N = pred.shape[0]

    flat_pairs = [(maj, mi) for maj, mins in majority_minority_pairs for mi in mins]
    P = len(flat_pairs)
    P_pad = _round_up(max(P, 1), 128)

    # Tile / padding. Small N -> one tile rounded to 16 (bf16 sublane packing);
    # large N -> T=tile with the N^2 cross tiled (reduction axis innermost).
    if N <= tile:
        T = _round_up(max(N, 16), 16)
        N_pad = T
    else:
        T = tile
        N_pad = _round_up(N, tile)
    GI = N_pad // T
    GJ = N_pad // T

    maj_idx = np.array([m for m, _ in flat_pairs], dtype=np.int32)
    min_idx = np.array([m for _, m in flat_pairs], dtype=np.int32)

    maj = sensitive[:, maj_idx]          # (N, P) majority masks
    mnr = sensitive[:, min_idx]          # (N, P) minority masks

    # Normalization precomputed once (empty group -> inf -> NaN, matching
    # torch.mean over an empty selection).
    inv = 1.0 / (jnp.sum(maj, axis=0) * jnp.sum(mnr, axis=0))   # (P,)

    def pad2(x):
        return jnp.pad(x, ((0, N_pad - N), (0, P_pad - P)))

    # 0/1 masks are exact in bf16: half the HBM bytes for the re-streamed slab.
    maj_slab = pad2(maj).astype(jnp.bfloat16)    # (N_pad, P_pad)
    min_slab = pad2(mnr).astype(jnp.bfloat16)    # (N_pad, P_pad)

    lab = jnp.pad(labels, (0, N_pad - N))
    prd = jnp.pad(pred, (0, N_pad - N))
    lab_col = lab.reshape(N_pad, 1)
    lab_row = lab.reshape(1, N_pad)
    prd_col = prd.reshape(N_pad, 1)
    prd_row = prd.reshape(1, N_pad)

    kernel = _make_kernel(is_regression, P_pad, mxu_bf16)

    if row_core_parallel:
        # Enable on v7x (2 TCs/chip) when GI is a multiple of the core count.
        dim_sem = (pltpu.CORE_PARALLEL, pltpu.ARBITRARY)
    else:
        dim_sem = ("parallel", "arbitrary")

    partial = pl.pallas_call(
        kernel,
        out_shape=jax.ShapeDtypeStruct((GI, 8, P_pad), jnp.float32),
        grid_spec=pltpu.PrefetchScalarGridSpec(
            num_scalar_prefetch=0,
            grid=(GI, GJ),
            in_specs=[
                pl.BlockSpec((T, 1), lambda bi, bj: (bi, 0)),        # labels (rows)
                pl.BlockSpec((T, 1), lambda bi, bj: (bi, 0)),        # pred   (rows)
                pl.BlockSpec((1, T), lambda bi, bj: (0, bj)),        # labels (cols)
                pl.BlockSpec((1, T), lambda bi, bj: (0, bj)),        # pred   (cols)
                pl.BlockSpec((T, P_pad), lambda bi, bj: (bi, 0)),    # majority masks
                pl.BlockSpec((T, P_pad), lambda bi, bj: (bj, 0)),    # minority masks
            ],
            out_specs=pl.BlockSpec((1, 8, P_pad), lambda bi, bj: (bi, 0, 0)),
            scratch_shapes=[pltpu.VMEM((8, P_pad), jnp.float32)],
        ),
        compiler_params=pltpu.CompilerParams(
            dimension_semantics=dim_sem,
            vmem_limit_bytes=48 * 1024 * 1024),
    )(lab_col, prd_col, lab_row, prd_row, maj_slab, min_slab)

    # Tiny glue: 8-sublane + row-block reduce, normalize, square.
    total = jnp.sum(partial.reshape(GI * 8, P_pad), axis=0)
    return jnp.square(total[:P] * inv)


def _reference_numpy(pred, labels, sensitive, pairs, is_regression=True):
    pred = np.asarray(pred, np.float32)
    labels = np.asarray(labels, np.float32)
    sensitive = np.asarray(sensitive, np.float32)
    result = []
    for maj, mins in pairs:
        maj_m = sensitive[:, maj] == 1
        maj_pred, maj_lab = pred[maj_m], labels[maj_m]
        for mi in mins:
            min_m = sensitive[:, mi] == 1
            min_pred, min_lab = pred[min_m], labels[min_m]
            diff = maj_pred[:, None] - min_pred[None, :]
            if is_regression:
                ldist = np.exp(-(maj_lab[:, None] - min_lab[None, :]) ** 2)
            else:
                ldist = 1.0 * (maj_lab[:, None] == min_lab[None, :])
            result.append(np.mean(diff * ldist) ** 2)
    return np.array(result, np.float32)


if __name__ == "__main__":
    key = jax.random.PRNGKey(0)
    k_pred, k_lab, k_a, k_b = jax.random.split(key, 4)

    N = 128   # samples
    pred = jax.random.normal(k_pred, (N,), dtype=jnp.float32)
    labels = jax.random.normal(k_lab, (N,), dtype=jnp.float32)

    # dummy-coded sensitive groups: attribute A -> cols (0,1), attribute B -> cols (2,3)
    a_min = jax.random.bernoulli(k_a, 0.4, (N,)).astype(jnp.float32)
    b_min = jax.random.bernoulli(k_b, 0.5, (N,)).astype(jnp.float32)
    sensitive = jnp.stack([1.0 - a_min, a_min, 1.0 - b_min, b_min], axis=1)
    pairs = [(0, [1]), (2, [3])]   # SensitiveMap.majority_minority_pairs equivalent

    # regression path
    out = jax.block_until_ready(
        cross_pair_distance(pred, labels, sensitive, pairs, is_regression=True))
    ref = _reference_numpy(pred, labels, sensitive, pairs, is_regression=True)
    np.testing.assert_allclose(np.asarray(out), ref, rtol=1e-5, atol=1e-6)

    # classification path (exact integral class codes)
    labels_cls = jnp.floor(labels * 2.0)
    out_c = jax.block_until_ready(
        cross_pair_distance(pred, labels_cls, sensitive, pairs, is_regression=False))
    ref_c = _reference_numpy(pred, labels_cls, sensitive, pairs, is_regression=False)
    np.testing.assert_allclose(np.asarray(out_c), ref_c, rtol=1e-5, atol=1e-6)

    # ragged N (exercises sublane/lane padding path)
    N2 = 50
    out2 = jax.block_until_ready(
        cross_pair_distance(pred[:N2], labels[:N2], sensitive[:N2], [(0, [1])],
                            is_regression=True))
    ref2 = _reference_numpy(pred[:N2], labels[:N2], sensitive[:N2], [(0, [1])],
                            is_regression=True)
    np.testing.assert_allclose(np.asarray(out2), ref2, rtol=1e-5, atol=1e-6)

    # multi-tile grid (exercises the bj reduction / accumulator init+finalize)
    k_p3, k_l3, k_a3, k_b3 = jax.random.split(jax.random.PRNGKey(1), 4)
    N3 = 300
    pred3 = jax.random.normal(k_p3, (N3,), dtype=jnp.float32)
    labels3 = jax.random.normal(k_l3, (N3,), dtype=jnp.float32)
    a3 = jax.random.bernoulli(k_a3, 0.4, (N3,)).astype(jnp.float32)
    b3 = jax.random.bernoulli(k_b3, 0.5, (N3,)).astype(jnp.float32)
    sens3 = jnp.stack([1.0 - a3, a3, 1.0 - b3, b3], axis=1)
    out3 = jax.block_until_ready(
        cross_pair_distance(pred3, labels3, sens3, pairs, is_regression=True, tile=128))
    ref3 = _reference_numpy(pred3, labels3, sens3, pairs, is_regression=True)
    np.testing.assert_allclose(np.asarray(out3), ref3, rtol=1e-5, atol=1e-6)

    # opt-in bf16 MXU mode: compile/run check only (relaxed-accuracy path)
    out_bf16 = jax.block_until_ready(
        cross_pair_distance(pred, labels, sensitive, pairs, is_regression=True,
                            mxu_bf16=True))
    assert out_bf16.shape == (2,) and bool(jnp.all(jnp.isfinite(out_bf16)))

    # TODO(synk): SensitiveMap NaN-membership handling (missing sensitive data) is
    # not modeled; masks are assumed to be clean 0/1 dummy codes.
    print("KERNEL_OK")
</pallas_src>

<mosaic_0001>
module attributes {stable_mosaic.version = 11 : i64} {
  func.func @kernel(%arg0: i32, %arg1: i32, %arg2: memref<128x1xf32, #tpu.memory_space<vmem>>, %arg3: memref<128x1xf32, #tpu.memory_space<vmem>>, %arg4: memref<1x128xf32, #tpu.memory_space<vmem>>, %arg5: memref<1x128xf32, #tpu.memory_space<vmem>>, %arg6: memref<128x128xbf16, #tpu.memory_space<vmem>>, %arg7: memref<128x128xbf16, #tpu.memory_space<vmem>>, %arg8: memref<1x8x128xf32, #tpu.memory_space<vmem>>, %arg9: memref<8x128xf32, #tpu.memory_space<vmem>>) attributes {dimension_semantics = [#tpu.dimension_semantics<parallel>, #tpu.dimension_semantics<arbitrary>], iteration_bounds = array<i64: 1, 1>, scalar_prefetch = 0 : i64, scratch_operands = 1 : i64, tpu.core_type = #tpu.core_type<tc>, window_params = [{transform_indices = @transform_0, window_bounds = array<i64: 128, 1>}, {transform_indices = @transform_1, window_bounds = array<i64: 128, 1>}, {transform_indices = @transform_2, window_bounds = array<i64: 1, 128>}, {transform_indices = @transform_3, window_bounds = array<i64: 1, 128>}, {transform_indices = @transform_4, window_bounds = array<i64: 128, 128>}, {transform_indices = @transform_5, window_bounds = array<i64: 128, 128>}, {transform_indices = @transform_6, window_bounds = array<i64: 1, 8, 128>}]} {
    %c0_i32 = arith.constant 0 : i32
    %0 = arith.cmpi eq, %arg1, %c0_i32 : i32
    %1 = arith.extui %0 : i1 to i32
    %c0_i32_0 = arith.constant 0 : i32
    %2 = arith.cmpi ne, %1, %c0_i32_0 : i32
    scf.if %2 {
      %cst_20 = arith.constant 0.000000e+00 : f32
      %32 = vector.broadcast %cst_20 : f32 to vector<8x128xf32>
      %c0_21 = arith.constant 0 : index
      %c0_22 = arith.constant 0 : index
      %33 = vector.load %arg9[%c0_21, %c0_22] : memref<8x128xf32, #tpu.memory_space<vmem>>, vector<8x128xf32>
      tpu.vector_store %arg9[%c0_21, %c0_22], %32 {strides = array<i32>} : memref<8x128xf32, #tpu.memory_space<vmem>>, vector<8x128xf32>,
    } else {
    }
    %c0 = arith.constant 0 : index
    %c0_1 = arith.constant 0 : index
    %3 = vector.load %arg2[%c0, %c0_1] : memref<128x1xf32, #tpu.memory_space<vmem>>, vector<128x1xf32>
    %c0_2 = arith.constant 0 : index
    %c0_3 = arith.constant 0 : index
    %4 = vector.load %arg4[%c0_2, %c0_3] : memref<1x128xf32, #tpu.memory_space<vmem>>, vector<1x128xf32>
    %c0_4 = arith.constant 0 : index
    %c0_5 = arith.constant 0 : index
    %5 = vector.load %arg3[%c0_4, %c0_5] : memref<128x1xf32, #tpu.memory_space<vmem>>, vector<128x1xf32>
    %c0_6 = arith.constant 0 : index
    %c0_7 = arith.constant 0 : index
    %6 = vector.load %arg5[%c0_6, %c0_7] : memref<1x128xf32, #tpu.memory_space<vmem>>, vector<1x128xf32>
    %7 = vector.broadcast %3 : vector<128x1xf32> to vector<128x128xf32>
    %8 = vector.broadcast %4 : vector<1x128xf32> to vector<128x128xf32>
    %9 = arith.subf %7, %8 : vector<128x128xf32>
    %10 = arith.mulf %9, %9 : vector<128x128xf32>
    %cst = arith.constant 0.000000e+00 : f32
    %11 = vector.broadcast %cst : f32 to vector<128x128xf32>
    %12 = arith.subf %11, %10 : vector<128x128xf32>
    %13 = math.exp %12 : vector<128x128xf32>
    %14 = vector.broadcast %5 : vector<128x1xf32> to vector<128x128xf32>
    %15 = vector.broadcast %6 : vector<1x128xf32> to vector<128x128xf32>
    %16 = arith.subf %14, %15 : vector<128x128xf32>
    %17 = arith.mulf %13, %16 : vector<128x128xf32>
    %c0_8 = arith.constant 0 : index
    %c0_9 = arith.constant 0 : index
    %18 = vector.load %arg7[%c0_8, %c0_9] : memref<128x128xbf16, #tpu.memory_space<vmem>>, vector<128x128xbf16>
    %19 = arith.extf %18 : vector<128x128xbf16> to vector<128x128xf32>
    %cst_10 = arith.constant dense<0.000000e+00> : vector<128x128xf32>
    %20 = tpu.matmul %17, %19, %cst_10 {dimension_numbers = #tpu.dot_dimension_numbers<[1], [0], [0], [1], [0, 0, 1, 1], [], []>} : vector<128x128xf32>, vector<128x128xf32>, vector<128x128xf32> -> vector<128x128xf32>
    %c0_11 = arith.constant 0 : index
    %c0_12 = arith.constant 0 : index
    %21 = vector.load %arg6[%c0_11, %c0_12] : memref<128x128xbf16, #tpu.memory_space<vmem>>, vector<128x128xbf16>
    %22 = arith.extf %21 : vector<128x128xbf16> to vector<128x128xf32>
    %23 = arith.mulf %22, %20 : vector<128x128xf32>
    %c0_13 = arith.constant 0 : index
    %c0_14 = arith.constant 0 : index
    %24 = vector.load %arg9[%c0_13, %c0_14] : memref<8x128xf32, #tpu.memory_space<vmem>>, vector<8x128xf32>
    %25 = vector.shape_cast %23 : vector<128x128xf32> to vector<16x8x128xf32>
    %cst_15 = arith.constant dense<0.000000e+00> : vector<8x128xf32>
    %26 = vector.multi_reduction <add>, %25, %cst_15 [0] : vector<16x8x128xf32> to vector<8x128xf32>
    %27 = arith.addf %24, %26 : vector<8x128xf32>
    %c0_16 = arith.constant 0 : index
    %c0_17 = arith.constant 0 : index
    %28 = vector.load %arg9[%c0_16, %c0_17] : memref<8x128xf32, #tpu.memory_space<vmem>>, vector<8x128xf32>
    tpu.vector_store %arg9[%c0_16, %c0_17], %27 {strides = array<i32>} : memref<8x128xf32, #tpu.memory_space<vmem>>, vector<8x128xf32>,
    %c0_i32_18 = arith.constant 0 : i32
    %29 = arith.cmpi eq, %arg1, %c0_i32_18 : i32
    %30 = arith.extui %29 : i1 to i32
    %c0_i32_19 = arith.constant 0 : i32
    %31 = arith.cmpi ne, %30, %c0_i32_19 : i32
    scf.if %31 {
      %c0_20 = arith.constant 0 : index
      %c0_21 = arith.constant 0 : index
      %32 = vector.load %arg9[%c0_20, %c0_21] : memref<8x128xf32, #tpu.memory_space<vmem>>, vector<8x128xf32>
      %33 = vector.shape_cast %32 : vector<8x128xf32> to vector<1x8x128xf32>
      %c0_22 = arith.constant 0 : index
      %c0_23 = arith.constant 0 : index
      %c0_24 = arith.constant 0 : index
      %34 = vector.load %arg8[%c0_22, %c0_23, %c0_24] : memref<1x8x128xf32, #tpu.memory_space<vmem>>, vector<1x8x128xf32>
      tpu.vector_store %arg8[%c0_22, %c0_23, %c0_24], %33 {strides = array<i32>} : memref<1x8x128xf32, #tpu.memory_space<vmem>>, vector<1x8x128xf32>,
    } else {
    }
    return
  }
  func.func @transform_0(%arg0: i32, %arg1: i32) -> (i32, i32) {
    %c0_i32 = arith.constant 0 : i32
    %c0_i32_0 = arith.constant 0 : i32
    return %arg0, %c0_i32 : i32, i32
  }
  func.func @transform_1(%arg0: i32, %arg1: i32) -> (i32, i32) {
    %c0_i32 = arith.constant 0 : i32
    %c0_i32_0 = arith.constant 0 : i32
    return %arg0, %c0_i32 : i32, i32
  }
  func.func @transform_2(%arg0: i32, %arg1: i32) -> (i32, i32) {
    %c0_i32 = arith.constant 0 : i32
    %c0_i32_0 = arith.constant 0 : i32
    return %c0_i32, %arg1 : i32, i32
  }
  func.func @transform_3(%arg0: i32, %arg1: i32) -> (i32, i32) {
    %c0_i32 = arith.constant 0 : i32
    %c0_i32_0 = arith.constant 0 : i32
    return %c0_i32, %arg1 : i32, i32
  }
  func.func @transform_4(%arg0: i32, %arg1: i32) -> (i32, i32) {
    %c0_i32 = arith.constant 0 : i32
    %c0_i32_0 = arith.constant 0 : i32
    return %arg0, %c0_i32 : i32, i32
  }
  func.func @transform_5(%arg0: i32, %arg1: i32) -> (i32, i32) {
    %c0_i32 = arith.constant 0 : i32
    %c0_i32_0 = arith.constant 0 : i32
    return %arg1, %c0_i32 : i32, i32
  }
  func.func @transform_6(%arg0: i32, %arg1: i32) -> (i32, i32, i32) {
    %c0_i32 = arith.constant 0 : i32
    %c0_i32_0 = arith.constant 0 : i32
    %c0_i32_1 = arith.constant 0 : i32
    return %arg0, %c0_i32, %c0_i32_0 : i32, i32, i32
  }
}

</mosaic_0001>

<bundles_post_ra>
// kernel: tpu_custom_call.1
= control target key start
LH: loop header
LB: loop body
LE: loop exit
PB: predicated region body
PF: predicated region fallthrough
CT: control target
= control target key end

     0   :  { %v716_v3 = vmov 0   ;;  %s945_s0 = inlined_call_operand.vmem [shape: f32[128,1], index: 0, kind: input, shape index: {}]   ;;  %s946_s1 = inlined_call_operand.vmem [shape: f32[128,1], index: 1, kind: input, shape index: {}]   ;;  %s947_s2 = inlined_call_operand.vmem [shape: f32[1,128], index: 2, kind: input, shape index: {}]   ;;  %s948_s3 = inlined_call_operand.vmem [shape: f32[1,128], index: 3, kind: input, shape index: {}]   ;;  %s949_s4 = inlined_call_operand.vmem [shape: bf16[128,128], index: 4, kind: input, shape index: {}]   ;;  %s950_s5 = inlined_call_operand.vmem [shape: bf16[128,128], index: 5, kind: input, shape index: {}]   ;;  %s951_s6 = inlined_call_operand.hbm [shape: f32[1,8,128], index: 6, kind: output, shape index: {}]  }
   0x1   :  { %v46_v0 = vld [vmem:[%s946_s1] sm:$0xff]  ;;  %655 = vset.pattern.permute.xlu2 %v716_v3  ;;  %654 = vset.pattern.permute.xlu1 %v716_v3 }
   0x2   :  { %v33_v1 = vld [vmem:[%s945_s0 + $0x20] sm:$0xff]  ;;  %653 = vset.pattern.permute.xlu0 %v716_v3  ;;  %228 = vperm.xlu2 %655, %v46_v0  }
   0x3   :  { %v29_v2 = vld [vmem:[%s945_s0] sm:$0xff]  ;;  %85 = vperm.xlu1 %654, %v33_v1  }
   0x4   :  { %65 = vperm.xlu0 %653, %v29_v2  }
   0x5   :  { %11 = vsyncpa [#allocation4], 0  ;;  %v31_v4 = vld [vmem:[%s945_s0 + $0x10] sm:$0xff]  ;;  %v37_v5 = vld [vmem:[%s945_s0 + $0x40] sm:$0xff]  ;;  %s717_s19 = smov [#allocation3]   ;;  %s516_s22 = sshll.u32 %s951_s6, 4  ;;  %s517_s22 = int_to_ptr.hbm [resolvable:$true] %s516_s22 }
   0x6   :  { %v30_v6 = vld [vmem:[%s945_s0 + $0x8] sm:$0xff]  ;;  %v41_v7 = vld [vmem:[%s945_s0 + $0x60] sm:$0xff]  ;;  %v39_v13 = vld [vmem:[%s945_s0 + $0x50] sm:$0xff] }
   0x7   :  { %v38_v8 = vld [vmem:[%s945_s0 + $0x48] sm:$0xff]  ;;  %v54_v10 = vld [vmem:[%s946_s1 + $0x40] sm:$0xff]  ;;  %v35_v14 = vld [vmem:[%s945_s0 + $0x30] sm:$0xff] }
   0x8   :  { %v34_v9 = vld [vmem:[%s945_s0 + $0x28] sm:$0xff]  ;;  %v50_v11 = vld [vmem:[%s946_s1 + $0x20] sm:$0xff]  ;;  %v32_v15 = vld [vmem:[%s945_s0 + $0x18] sm:$0xff] }
   0x9   :  { %v47_v12 = vld [vmem:[%s946_s1 + $0x8] sm:$0xff]  ;;  %v48_v17 = vld [vmem:[%s946_s1 + $0x10] sm:$0xff]  ;;  %v36_v19 = vld [vmem:[%s945_s0 + $0x38] sm:$0xff] }
   0xa   :  { %75 = vperm.xlu2 %655, %v31_v4   ;;  %v51_v16 = vld [vmem:[%s946_s1 + $0x28] sm:$0xff]  ;;  %v58_v20 = vld [vmem:[%s946_s1 + $0x60] sm:$0xff]  ;;  %v49_v22 = vld [vmem:[%s946_s1 + $0x18] sm:$0xff] }
   0xb   :  { %105 = vperm.xlu1 %654, %v37_v5   ;;  %v42_v18 = vld [vmem:[%s945_s0 + $0x68] sm:$0xff]  ;;  %v43_v23 = vld [vmem:[%s945_s0 + $0x70] sm:$0xff]  ;;  %v40_v24 = vld [vmem:[%s945_s0 + $0x58] sm:$0xff] }
   0xc   :  { %70 = vperm.xlu0 %653, %v30_v6   ;;  %v55_v21 = vld [vmem:[%s946_s1 + $0x48] sm:$0xff]  ;;  %v56_v26 = vld [vmem:[%s946_s1 + $0x50] sm:$0xff]  ;;  %v595_v28 = vld [vmem:[%s950_s5 + $0x38] sm:$0xff]  }
   0xd   :  { %v59_v25 = vld [vmem:[%s946_s1 + $0x68] sm:$0xff]  ;;  %v52_v27 = vld [vmem:[%s946_s1 + $0x30] sm:$0xff]  ;;  %v556_v29 = vunpack.c.h.bf16 %v595_v28  ;;  %v57_v30 = vld [vmem:[%s946_s1 + $0x58] sm:$0xff]  ;;  %v555_v33 = vunpack.c.l.bf16 %v595_v28 }
   0xe   :  { %v53_v31 = vld [vmem:[%s946_s1 + $0x38] sm:$0xff]  ;;  %v594_v34 = vld [vmem:[%s950_s5 + $0x30] sm:$0xff]   ;;  %v593_v37 = vld [vmem:[%s950_s5 + $0x28] sm:$0xff]  }
   0xf   :  { %v44_v32 = vld [vmem:[%s945_s0 + $0x78] sm:$0xff]  ;;  %373 = vmatpush.msra.mxu0 %v556_v29  ;;  %604 = vmatpush.msra.mxu2 %v556_v29  ;;  %v552_v35 = vunpack.c.h.bf16 %v594_v34  ;;  %v551_v36 = vunpack.c.l.bf16 %v594_v34  ;;  %v548_v38 = vunpack.c.h.bf16 %v593_v37  ;;  %v60_v40 = vld [vmem:[%s946_s1 + $0x70] sm:$0xff]  ;;  %v547_v41 = vunpack.c.l.bf16 %v593_v37  ;;  %v592_v42 = vld [vmem:[%s950_s5 + $0x20] sm:$0xff]  }
  0x10   :  { %603 = vmatpush.msra.mxu1 %v556_v29  ;;  %605 = vmatpush.msra.mxu3 %v556_v29  ;;  %v61_v39 = vld [vmem:[%s946_s1 + $0x78] sm:$0xff]  ;;  %v544_v43 = vunpack.c.h.bf16 %v592_v42  ;;  %v543_v44 = vunpack.c.l.bf16 %v592_v42  ;;  %v590_v48 = vld [vmem:[%s950_s5 + $0x10] sm:$0xff]   ;;  %v589_v52 = vld [vmem:[%s950_s5 + $0x8] sm:$0xff]   ;;  %s514_s1 = sshll.u32 %s717_s19, 4  ;;  %s515_s1 = int_to_ptr.vmem [resolvable:$true] %s514_s1 }
  0x11   :  { %374 = vmatpush.msra.mxu0 %v555_v33  ;;  %607 = vmatpush.msra.mxu2 %v555_v33  ;;  %v591_v45 = vld [vmem:[%s950_s5 + $0x18] sm:$0xff]   ;;  %v536_v49 = vunpack.c.h.bf16 %v590_v48  ;;  %v535_v51 = vunpack.c.l.bf16 %v590_v48  ;;  %v532_v53 = vunpack.c.h.bf16 %v589_v52  ;;  %v531_v54 = vunpack.c.l.bf16 %v589_v52  ;;  %v526_v55 = vld [vmem:[%s950_s5] sm:$0xff]  }
  0x12   :  { %125 = vperm.xlu2 %655, %v41_v7   ;;  %606 = vmatpush.msra.mxu1 %v555_v33  ;;  %v540_v46 = vunpack.c.h.bf16 %v591_v45  ;;  %v539_v47 = vunpack.c.l.bf16 %v591_v45  ;;  %v528_v56 = vunpack.c.h.bf16 %v526_v55  ;;  %v527_v57 = vunpack.c.l.bf16 %v526_v55  ;;  %v878_v60 = vld [vmem:[%s947_s2] ss:$0 sm:$0xff] }
  0x13   :  { %110 = vperm.xlu1 %654, %v38_v8   ;;  %375 = vmatpush.msra.mxu0 %v552_v35 }
  0x14   :  { %90 = vperm.xlu0 %653, %v34_v9   ;;  %608 = vmatpush.msra.mxu3 %v555_v33 }
  0x15   :  { %376 = vmatpush.msra.mxu0 %v551_v36  ;;  %610 = vmatpush.msra.mxu2 %v552_v35 }
  0x16   :  { %609 = vmatpush.msra.mxu1 %v552_v35  ;;  %611 = vmatpush.msra.mxu3 %v552_v35 }
  0x17   :  { %377 = vmatpush.msra.mxu0 %v548_v38  ;;  %613 = vmatpush.msra.mxu2 %v551_v36 }
  0x18   :  { %612 = vmatpush.msra.mxu1 %v551_v36  ;;  %614 = vmatpush.msra.mxu3 %v551_v36 }
  0x19   :  { %378 = vmatpush.msra.mxu0 %v547_v41  ;;  %616 = vmatpush.msra.mxu2 %v548_v38 }
  0x1a   :  { %268 = vperm.xlu2 %655, %v54_v10   ;;  %615 = vmatpush.msra.mxu1 %v548_v38  ;;  %v887_v10 = vld [vmem:[%s948_s3] ss:$0 sm:$0xff] }
  0x1b   :  { %248 = vperm.xlu1 %654, %v50_v11   ;;  %379 = vmatpush.msra.mxu0 %v544_v43 }
  0x1c   :  { %233 = vperm.xlu0 %653, %v47_v12   ;;  %619 = vmatpush.msra.mxu2 %v547_v41 }
  0x1d   :  { %617 = vmatpush.msra.mxu3 %v548_v38  ;;  %380 = vmatpush.msra.mxu0 %v543_v44 }
  0x1e   :  { %622 = vmatpush.msra.mxu2 %v544_v43  ;;  %618 = vmatpush.msra.mxu1 %v547_v41 }
  0x1f   :  { %620 = vmatpush.msra.mxu3 %v547_v41  ;;  %381 = vmatpush.msra.mxu0 %v540_v46 }
  0x20   :  { %625 = vmatpush.msra.mxu2 %v543_v44  ;;  %621 = vmatpush.msra.mxu1 %v544_v43 }
  0x21   :  { %623 = vmatpush.msra.mxu3 %v544_v43  ;;  %382 = vmatpush.msra.mxu0 %v539_v47 }
  0x22   :  { %115 = vperm.xlu2 %655, %v39_v13   ;;  %628 = vmatpush.msra.mxu2 %v540_v46 }
  0x23   :  { %95 = vperm.xlu1 %654, %v35_v14   ;;  %624 = vmatpush.msra.mxu1 %v543_v44 }
  0x24   :  { %80 = vperm.xlu0 %653, %v32_v15   ;;  %631 = vmatpush.msra.mxu2 %v539_v47 }
  0x25   :  { %626 = vmatpush.msra.mxu3 %v543_v44  ;;  %383 = vmatpush.msra.mxu0 %v536_v49 }
  0x26   :  { %627 = vmatpush.msra.mxu1 %v540_v46  ;;  %634 = vmatpush.msra.mxu2 %v536_v49 }
  0x27   :  { %629 = vmatpush.msra.mxu3 %v540_v46  ;;  %384 = vmatpush.msra.mxu0 %v535_v51 }
  0x28   :  { %630 = vmatpush.msra.mxu1 %v539_v47  ;;  %637 = vmatpush.msra.mxu2 %v535_v51 }
  0x29   :  { %632 = vmatpush.msra.mxu3 %v539_v47  ;;  %385 = vmatpush.msra.mxu0 %v532_v53 }
  0x2a   :  { %253 = vperm.xlu2 %655, %v51_v16   ;;  %633 = vmatpush.msra.mxu1 %v536_v49 }
  0x2b   :  { %238 = vperm.xlu1 %654, %v48_v17   ;;  %640 = vmatpush.msra.mxu2 %v532_v53 }
  0x2c   :  { %130 = vperm.xlu0 %653, %v42_v18   ;;  %635 = vmatpush.msra.mxu3 %v536_v49 }
  0x2d   :  { %386 = vmatpush.msra.mxu0 %v531_v54  ;;  %636 = vmatpush.msra.mxu1 %v535_v51 }
  0x2e   :  { %643 = vmatpush.msra.mxu2 %v531_v54  ;;  %638 = vmatpush.msra.mxu3 %v535_v51 }
  0x2f   :  { %387 = vmatpush.msra.mxu0 %v528_v56  ;;  %639 = vmatpush.msra.mxu1 %v532_v53 }
  0x30   :  { %646 = vmatpush.msra.mxu2 %v528_v56  ;;  %641 = vmatpush.msra.mxu3 %v532_v53 }
  0x31   :  { %388 = vmatpush.msra.mxu0 %v527_v57  ;;  %642 = vmatpush.msra.mxu1 %v531_v54 }
  0x32   :  { %100 = vperm.xlu2 %655, %v36_v19   ;;  %649 = vmatpush.msra.mxu2 %v527_v57 }
  0x33   :  { %288 = vperm.xlu1 %654, %v58_v20   ;;  %644 = vmatpush.msra.mxu3 %v531_v54 }
  0x34   :  { %273 = vperm.xlu0 %653, %v55_v21   ;;  %645 = vmatpush.msra.mxu1 %v528_v56 }
  0x35   :  { %647 = vmatpush.msra.mxu3 %v528_v56 }
  0x36   :  { %648 = vmatpush.msra.mxu1 %v527_v57 }
  0x37   :  { %650 = vmatpush.msra.mxu3 %v527_v57 }
  0x3a   :  { %243 = vperm.xlu2 %655, %v49_v22  }
  0x3b   :  { %135 = vperm.xlu1 %654, %v43_v23  }
  0x3c   :  { %120 = vperm.xlu0 %653, %v40_v24  }
  0x42   :  { %293 = vperm.xlu2 %655, %v59_v25  }
  0x43   :  { %278 = vperm.xlu1 %654, %v56_v26  }
  0x44   :  { %258 = vperm.xlu0 %653, %v52_v27  }
  0x4a   :  { %283 = vperm.xlu2 %655, %v57_v30  }
  0x4b   :  { %263 = vperm.xlu1 %654, %v53_v31  }
  0x4c   :  { %140 = vperm.xlu0 %653, %v44_v32  }
  0x53   :  { %303 = vperm.xlu1 %654, %v61_v39  }
  0x54   :  { %298 = vperm.xlu0 %653, %v60_v40  }
  0x5c   :  { %v867_v50 = vpop.permute.xlu2 %228 }
  0x5d   :  { %v309_v16 = vsub.f32 %v867_v50, %v887_v10 }
  0x64   :  { %v76_v58 = vpop.permute.xlu2 %75 }
  0x65   :  { %v148_v27 = vsub.f32 %v76_v58, %v878_v60 }
  0x67   :  { %v164_v32 = vmul.f32 %v148_v27, %v148_v27 }
  0x69   :  { %v180_v44 = vsub.f32 0.0, %v164_v32 }
  0x6b   :  { %v198_v48 = vmul.f32 1.442695, %v180_v44 }
  0x6c   :  { %v126_v59 = vpop.permute.xlu2 %125 }
  0x6d   :  { %v158_v41 = vsub.f32 %v126_v59, %v878_v60 }
  0x6f   :  { %v174_v46 = vmul.f32 %v158_v41, %v158_v41 }
  0x71   :  { %v190_v54 = vsub.f32 0.0, %v174_v46 }
  0x74   :  { %v269_v2 = vpop.permute.xlu2 %268 }
  0x75   :  { %v86_v61 = vpop.permute.xlu1 %85  ;;  %v317_v29 = vsub.f32 %v269_v2, %v887_v10 }
  0x76   :  { %v66_v62 = vpop.permute.xlu0 %65  ;;  %v150_v0 = vsub.f32 %v86_v61, %v878_v60  ;;  %v218_v61 = vmul.f32 1.442695, %v190_v54 }
  0x77   :  { %v146_v63 = vsub.f32 %v66_v62, %v878_v60 }
  0x78   :  { %v166_v4 = vmul.f32 %v150_v0, %v150_v0 }
  0x79   :  { %v162_v1 = vmul.f32 %v146_v63, %v146_v63 }
  0x7a   :  { %v182_v11 = vsub.f32 0.0, %v166_v4 }
  0x7b   :  { %v178_v3 = vsub.f32 0.0, %v162_v1 }
  0x7c   :  { %v202_v17 = vmul.f32 1.442695, %v182_v11  ;;  %v116_v19 = vpop.permute.xlu2 %115 }
  0x7d   :  { %v194_v5 = vmul.f32 1.442695, %v178_v3  ;;  %v106_v6 = vpop.permute.xlu1 %105 }
  0x7e   :  { %v71_v7 = vpop.permute.xlu0 %70  ;;  %v154_v8 = vsub.f32 %v106_v6, %v878_v60 }
  0x7f   :  { %v147_v9 = vsub.f32 %v71_v7, %v878_v60  ;;  %658 = vpow2.f32 %v194_v5  ;;  %v156_v5 = vsub.f32 %v116_v19, %v878_v60 }
  0x80   :  { %v170_v12 = vmul.f32 %v154_v8, %v154_v8 }
  0x81   :  { %v163_v13 = vmul.f32 %v147_v9, %v147_v9 }
  0x82   :  { %v186_v14 = vsub.f32 0.0, %v170_v12  ;;  %v172_v12 = vmul.f32 %v156_v5, %v156_v5 }
  0x83   :  { %v179_v15 = vsub.f32 0.0, %v163_v13 }
  0x84   :  { %v210_v18 = vmul.f32 1.442695, %v186_v14  ;;  %v254_v37 = vpop.permute.xlu2 %253 }
  0x85   :  { %v659_v20 = vpop.eup %658  ;;  %v196_v21 = vmul.f32 1.442695, %v179_v15  ;;  %v111_v22 = vpop.permute.xlu1 %110  ;;  %v314_v52 = vsub.f32 %v254_v37, %v887_v10 }
  0x86   :  { %v91_v23 = vpop.permute.xlu0 %90  ;;  %660 = vpow2.f32 %v210_v18  ;;  %v325_v25 = vmul.f32 %v659_v20, %v309_v16  ;;  %v155_v45 = vsub.f32 %v111_v22, %v878_v60 }
  0x87   :  { %v151_v24 = vsub.f32 %v91_v23, %v878_v60  ;;  %662 = vpow2.f32 %v202_v17  ;;  %v188_v23 = vsub.f32 0.0, %v172_v12 }
  0x88   :  { %389 = vmatmul.f32.vlgmr.msra.gmra.mxu0 %v325_v25  ;;  %664 = vpow2.f32 %v196_v21  ;;  %v171_v49 = vmul.f32 %v155_v45, %v155_v45 }
  0x89   :  { %v167_v26 = vmul.f32 %v151_v24, %v151_v24 }
  0x8a   :  { %v187_v58 = vsub.f32 0.0, %v171_v49 }
  0x8b   :  { %v183_v28 = vsub.f32 0.0, %v167_v26 }
  0x8c   :  { %v661_v30 = vpop.eup %660  ;;  %v101_v55 = vpop.permute.xlu2 %100  ;;  %v212_v63 = vmul.f32 1.442695, %v187_v58 }
  0x8d   :  { %v204_v31 = vmul.f32 1.442695, %v183_v28  ;;  %v249_v33 = vpop.permute.xlu1 %248  ;;  %v333_v35 = vmul.f32 %v661_v30, %v317_v29  ;;  %v663_v36 = vpop.eup %662  ;;  %v153_v27 = vsub.f32 %v101_v55, %v878_v60  ;;  %v214_v29 = vmul.f32 1.442695, %v188_v23 }
  0x8e   :  { %v234_v34 = vpop.permute.xlu0 %233  ;;  %v313_v38 = vsub.f32 %v249_v33, %v887_v10  ;;  %v665_v40 = vpop.eup %664 }
  0x8f   :  { %v310_v39 = vsub.f32 %v234_v34, %v887_v10  ;;  %666 = vpow2.f32 %v204_v31  ;;  %413 = vmatmul.f32.vlgmr.msra.gmra.mxu2 %v333_v35  ;;  %v169_v31 = vmul.f32 %v153_v27, %v153_v27 }
  0x90   :  { %v329_v43 = vmul.f32 %v663_v36, %v313_v38  ;;  %668 = vpow2.f32 %v198_v48 }
  0x91   :  { %v326_v42 = vmul.f32 %v665_v40, %v310_v39  ;;  %v185_v39 = vsub.f32 0.0, %v169_v31 }
  0x92   :  { %401 = vmatmul.f32.vlgmr.msra.gmra.mxu1 %v329_v43 }
  0x93   :  { %392 = vmatmul.f32.gmra.mxu0 %v326_v42  ;;  %v208_v44 = vmul.f32 1.442695, %v185_v39 }
  0x94   :  { %v244_v9 = vpop.permute.xlu2 %243 }
  0x95   :  { %v667_v47 = vpop.eup %666  ;;  %v96_v50 = vpop.permute.xlu1 %95  ;;  %v312_v20 = vsub.f32 %v244_v9, %v887_v10 }
  0x96   :  { %v81_v51 = vpop.permute.xlu0 %80  ;;  %v330_v57 = vmul.f32 %v667_v47, %v314_v52  ;;  %v669_v4 = vpop.eup %668  ;;  %v152_v8 = vsub.f32 %v96_v50, %v878_v60 }
  0x97   :  { %v149_v53 = vsub.f32 %v81_v51, %v878_v60 }
  0x98   :  { %v168_v15 = vmul.f32 %v152_v8, %v152_v8 }
  0x99   :  { %v165_v56 = vmul.f32 %v149_v53, %v149_v53 }
  0x9a   :  { %404 = vmatmul.f32.gmra.mxu1 %v330_v57  ;;  %v184_v28 = vsub.f32 0.0, %v168_v15 }
  0x9b   :  { %v181_v59 = vsub.f32 0.0, %v165_v56 }
  0x9c   :  { %v294_v30 = vpop.permute.xlu2 %293  ;;  %v206_v32 = vmul.f32 1.442695, %v184_v28 }
  0x9d   :  { %v200_v62 = vmul.f32 1.442695, %v181_v59  ;;  %v239_v0 = vpop.permute.xlu1 %238  ;;  %v322_v37 = vsub.f32 %v294_v30, %v887_v10 }
  0x9e   :  { %v131_v1 = vpop.permute.xlu0 %130  ;;  %v311_v2 = vsub.f32 %v239_v0, %v887_v10 }
  0x9f   :  { %v159_v3 = vsub.f32 %v131_v1, %v878_v60  ;;  %670 = vpow2.f32 %v200_v62 }
  0xa0   :  { %672 = vpow2.f32 %v218_v61  ;;  %v327_v7 = vmul.f32 %v669_v4, %v311_v2 }
  0xa1   :  { %v175_v6 = vmul.f32 %v159_v3, %v159_v3  ;;  %674 = vpow2.f32 %v212_v63 }
  0xa2   :  { %395 = vmatmul.f32.gmra.mxu0 %v327_v7 }
  0xa3   :  { %v191_v11 = vsub.f32 0.0, %v175_v6 }
  0xa4   :  { %v284_v55 = vpop.permute.xlu2 %283 }
  0xa5   :  { %v220_v13 = vmul.f32 1.442695, %v191_v11  ;;  %v671_v14 = vpop.eup %670  ;;  %v289_v16 = vpop.permute.xlu1 %288  ;;  %v320_v61 = vsub.f32 %v284_v55, %v887_v10 }
  0xa6   :  { %v274_v17 = vpop.permute.xlu0 %273  ;;  %v673_v18 = vpop.eup %672  ;;  %v321_v19 = vsub.f32 %v289_v16, %v887_v10  ;;  %v328_v24 = vmul.f32 %v671_v14, %v312_v20  ;;  %v596_v20 = vld [vmem:[%s949_s4 + $0x8] sm:$0xff]  }
  0xa7   :  { %v318_v21 = vsub.f32 %v274_v17, %v887_v10  ;;  %v675_v22 = vpop.eup %674  ;;  %676 = vpow2.f32 %v220_v13 }
  0xa8   :  { %v337_v26 = vmul.f32 %v673_v18, %v321_v19  ;;  %678 = vpow2.f32 %v214_v29  ;;  %v558_v18 = vld [vmem:[%s949_s4] sm:$0xff]   ;;  %v597_v29 = vld [vmem:[%s949_s4 + $0x10] sm:$0xff]  }
  0xa9   :  { %v334_v25 = vmul.f32 %v675_v22, %v318_v21  ;;  %680 = vpow2.f32 %v206_v32  ;;  %v560_v19 = vunpack.c.h.bf16 %v558_v18  ;;  %v559_v21 = vunpack.c.l.bf16 %v558_v18 }
  0xaa   :  { %398 = vmatmul.f32.gmra.mxu0 %v328_v24  ;;  %425 = vmatmul.f32.vlgmr.msra.gmra.mxu3 %v337_v26  ;;  %v563_v22 = vunpack.c.l.bf16 %v596_v20  ;;  %v567_v32 = vunpack.c.l.bf16 %v597_v29  ;;  %v568_v39 = vunpack.c.h.bf16 %v597_v29 }
  0xab   :  { %416 = vmatmul.f32.gmra.mxu2 %v334_v25 }
  0xad   :  { %v136_v33 = vpop.permute.xlu1 %135  ;;  %v677_v35 = vpop.eup %676 }
  0xae   :  { %v121_v34 = vpop.permute.xlu0 %120  ;;  %v160_v40 = vsub.f32 %v136_v33, %v878_v60  ;;  %v338_v41 = vmul.f32 %v677_v35, %v322_v37  ;;  %v679_v48 = vpop.eup %678  ;;  %v598_v35 = vld [vmem:[%s949_s4 + $0x18] sm:$0xff]  }
  0xaf   :  { %v157_v36 = vsub.f32 %v121_v34, %v878_v60  ;;  %v681_v51 = vpop.eup %680 }
  0xb0   :  { %v176_v45 = vmul.f32 %v160_v40, %v160_v40  ;;  %v571_v40 = vunpack.c.l.bf16 %v598_v35 }
  0xb1   :  { %v173_v38 = vmul.f32 %v157_v36, %v157_v36 }
  0xb2   :  { %428 = vmatmul.f32.gmra.mxu3 %v338_v41  ;;  %v192_v54 = vsub.f32 0.0, %v176_v45 }
  0xb3   :  { %v189_v42 = vsub.f32 0.0, %v173_v38 }
  0xb4   :  { %v222_v57 = vmul.f32 1.442695, %v192_v54 }
  0xb5   :  { %v216_v43 = vmul.f32 1.442695, %v189_v42  ;;  %v279_v46 = vpop.permute.xlu1 %278  ;;  %v599_v42 = vld [vmem:[%s949_s4 + $0x20] sm:$0xff]  }
  0xb6   :  { %v259_v47 = vpop.permute.xlu0 %258  ;;  %v319_v49 = vsub.f32 %v279_v46, %v887_v10  ;;  %v572_v46 = vunpack.c.h.bf16 %v598_v35 }
  0xb7   :  { %v315_v50 = vsub.f32 %v259_v47, %v887_v10  ;;  %682 = vpow2.f32 %v216_v43 }
  0xb8   :  { %v335_v53 = vmul.f32 %v679_v48, %v319_v49  ;;  %684 = vpow2.f32 %v208_v44  ;;  %v575_v48 = vunpack.c.l.bf16 %v599_v42 }
  0xb9   :  { %v331_v52 = vmul.f32 %v681_v51, %v315_v50  ;;  %686 = vpow2.f32 %v222_v57  ;;  %v600_v50 = vld [vmem:[%s949_s4 + $0x28] sm:$0xff]  }
  0xba   :  { %419 = vmatmul.f32.gmra.mxu2 %v335_v53 }
  0xbb   :  { %407 = vmatmul.f32.gmra.mxu1 %v331_v52  ;;  %v576_v52 = vunpack.c.h.bf16 %v599_v42 }
  0xbd   :  { %v683_v56 = vpop.eup %682  ;;  %v264_v58 = vpop.permute.xlu1 %263 }
  0xbe   :  { %v141_v59 = vpop.permute.xlu0 %140  ;;  %v316_v62 = vsub.f32 %v264_v58, %v887_v10  ;;  %v685_v0 = vpop.eup %684  ;;  %v336_v3 = vmul.f32 %v683_v56, %v320_v61  ;;  %v579_v56 = vunpack.c.l.bf16 %v600_v50  ;;  %v580_v61 = vunpack.c.h.bf16 %v600_v50 }
  0xbf   :  { %v161_v63 = vsub.f32 %v141_v59, %v878_v60  ;;  %v687_v8 = vpop.eup %686 }
  0xc0   :  { %v332_v2 = vmul.f32 %v685_v0, %v316_v62  ;;  %v601_v62 = vld [vmem:[%s949_s4 + $0x30] sm:$0xff]  }
  0xc1   :  { %v177_v1 = vmul.f32 %v161_v63, %v161_v63 }
  0xc2   :  { %422 = vmatmul.f32.gmra.mxu2 %v336_v3  ;;  %v583_v3 = vunpack.c.l.bf16 %v601_v62 }
  0xc3   :  { %v193_v4 = vsub.f32 0.0, %v177_v1  ;;  %410 = vmatmul.f32.gmra.mxu1 %v332_v2 }
  0xc5   :  { %v224_v5 = vmul.f32 1.442695, %v193_v4  ;;  %v304_v11 = vpop.permute.xlu1 %303 }
  0xc6   :  { %v299_v6 = vpop.permute.xlu0 %298  ;;  %v324_v60 = vsub.f32 %v304_v11, %v887_v10 }
  0xc7   :  { %v323_v7 = vsub.f32 %v299_v6, %v887_v10  ;;  %688 = vpow2.f32 %v224_v5  ;;  %v564_v10 = vunpack.c.h.bf16 %v596_v20 }
  0xc9   :  { %v339_v9 = vmul.f32 %v687_v8, %v323_v7  ;;  %v602_v7 = vld [vmem:[%s949_s4 + $0x38] sm:$0xff]  }
  0xcb   :  { %431 = vmatmul.f32.gmra.mxu3 %v339_v9  ;;  %v584_v9 = vunpack.c.h.bf16 %v601_v62 }
  0xcd   :  { %v689_v12 = vpop.eup %688 }
  0xce   :  { %v340_v13 = vmul.f32 %v689_v12, %v324_v60  ;;  %v587_v60 = vunpack.c.l.bf16 %v602_v7 }
  0xd3   :  { %434 = vmatmul.f32.gmra.mxu3 %v340_v13 }
 0x105   :  { %v390_v14 = vpop.f32.mrf.mxu0 }
 0x106   :  { %v470_v27 = vmul.f32 %v559_v21, %v390_v14 }
 0x10f   :  { %v402_v16 = vpop.f32.mrf.mxu1 }
 0x110   :  { %v393_v15 = vpop.f32.mrf.mxu0  ;;  %v474_v38 = vmul.f32 %v567_v32, %v402_v16  ;;  %v588_v16 = vunpack.c.h.bf16 %v602_v7 }
 0x111   :  { %v471_v24 = vmul.f32 %v560_v19, %v393_v15 }
 0x112   :  { %v414_v23 = vpop.f32.mrf.mxu2 }
 0x113   :  { %v487_v30 = vadd.f32 %v471_v24, %v470_v27  ;;  %v478_v55 = vmul.f32 %v575_v48, %v414_v23 }
 0x117   :  { %v405_v25 = vpop.f32.mrf.mxu1 }
 0x118   :  { %v475_v44 = vmul.f32 %v568_v39, %v405_v25 }
 0x11f   :  { %v396_v17 = vpop.f32.mrf.mxu0 }
 0x120   :  { %v472_v28 = vmul.f32 %v563_v22, %v396_v17 }
 0x122   :  { %v488_v33 = vadd.f32 %v487_v30, %v472_v28 }
 0x127   :  { %v399_v26 = vpop.f32.mrf.mxu0 }
 0x128   :  { %v473_v31 = vmul.f32 %v564_v10, %v399_v26 }
 0x12a   :  { %v489_v36 = vadd.f32 %v488_v33, %v473_v31 }
 0x12c   :  { %v490_v41 = vadd.f32 %v489_v36, %v474_v38 }
 0x12d   :  { %v426_v43 = vpop.f32.mrf.mxu3 }
 0x12e   :  { %v417_v34 = vpop.f32.mrf.mxu2  ;;  %v491_v49 = vadd.f32 %v490_v41, %v475_v44  ;;  %v482_v8 = vmul.f32 %v583_v3, %v426_v43 }
 0x12f   :  { %v479_v58 = vmul.f32 %v576_v52, %v417_v34 }
 0x135   :  { %v429_v63 = vpop.f32.mrf.mxu3 }
 0x136   :  { %v483_v13 = vmul.f32 %v584_v9, %v429_v63 }
 0x138   :  { %v408_v37 = vpop.f32.mrf.mxu1 }
 0x139   :  { %v476_v45 = vmul.f32 %v571_v40, %v408_v37 }
 0x13b   :  { %v492_v53 = vadd.f32 %v491_v49, %v476_v45 }
 0x13d   :  { %v420_v47 = vpop.f32.mrf.mxu2 }
 0x13e   :  { %v480_v1 = vmul.f32 %v579_v56, %v420_v47 }
 0x140   :  { %v411_v51 = vpop.f32.mrf.mxu1 }
 0x141   :  { %v477_v54 = vmul.f32 %v572_v46, %v411_v51 }
 0x143   :  { %v493_v57 = vadd.f32 %v492_v53, %v477_v54 }
 0x145   :  { %v494_v59 = vadd.f32 %v493_v57, %v478_v55  ;;  %v423_v0 = vpop.f32.mrf.mxu2 }
 0x146   :  { %v481_v4 = vmul.f32 %v580_v61, %v423_v0 }
 0x147   :  { %v495_v2 = vadd.f32 %v494_v59, %v479_v58 }
 0x149   :  { %v496_v5 = vadd.f32 %v495_v2, %v480_v1 }
 0x14b   :  { %v497_v6 = vadd.f32 %v496_v5, %v481_v4 }
 0x14d   :  { %v498_v12 = vadd.f32 %v497_v6, %v482_v8 }
 0x14e   :  { %v432_v11 = vpop.f32.mrf.mxu3 }
 0x14f   :  { %v484_v14 = vmul.f32 %v587_v60, %v432_v11  ;;  %v499_v15 = vadd.f32 %v498_v12, %v483_v13 }
 0x151   :  { %v500_v18 = vadd.f32 %v499_v15, %v484_v14 }
 0x156   :  { %v435_v17 = vpop.f32.mrf.mxu3 }
 0x157   :  { %v485_v20 = vmul.f32 %v588_v16, %v435_v17 }
 0x159   :  { %v501_v19 = vadd.f32 %v500_v18, %v485_v20 }
 0x15b   :  { %508 = vst [vmem:[#allocation3] sm:$0xff] %v501_v19 }
 0x15c   :  { %519 = dma.vmem_to_hbm [thread:$0]  %s515_s1, 128, %s517_s22, [#allocation4]  }
 0x15d   :  { %714 = dma.done.wait [#allocation4], 128  }
 0x15e   :  { %715 = vsyncadd [#allocation4], 4294967168 }
 0x15f   :  { %524 = vsyncpa [#allocation4], 1 }

</bundles_post_ra>
